<compile_context>
chip_gen: v7x
topology: tpu7x:2x2x1
jax: 0.10.0
libtpu: 0.0.40
codegen_flags: <defaults>
</compile_context>

<pallas_src>
import functools

import jax
import jax.numpy as jnp
from jax import lax
from jax.experimental import pallas as pl
from jax.experimental.pallas import tpu as pltpu


def _max_margin_kernel(e1n_ref, dr_ref, e2n_ref, dc_ref,
                       rowred_ref, colmax_ref,
                       *, margin, max_violation, true_b, tm):
    t = pl.program_id(0)
    row0 = t * tm

    x1 = e1n_ref[...]        # (tm, Dp) bf16  -- this tile's rows of normalized enc1
    f2 = e2n_ref[...]        # (Bp, Dp) bf16  -- all rows of normalized enc2 (resident)
    diag_r = dr_ref[...]     # (tm, 1)  f32   -- scores diagonal for this tile's rows
    diag_c = dc_ref[...]     # (1, Bp)  f32   -- full scores diagonal (per column)

    Bp = f2.shape[0]

    # scores tile: s[r, j] = <e1n[row0 + r], e2n[j]>  == (A @ B^T) on the MXU.
    # bf16 operands, f32 accumulation; no materialized operand transpose.
    nt_dims = (((1,), (1,)), ((), ()))
    s = lax.dot_general(x1, f2, nt_dims, preferred_element_type=jnp.float32)

    # cost_enc2[i, j] = clamp(margin + scores[i, j] - diag[i], min=0)
    # cost_enc1[i, j] = clamp(margin + scores[i, j] - diag[j], min=0)
    c2 = jnp.maximum(margin + s - diag_r, 0.0)
    c1 = jnp.maximum(margin + s - diag_c, 0.0)

    # Mask the diagonal and any batch-padding rows/columns to 0.  0 is neutral
    # for both reductions: every clamped cost is >= 0 and the reference's
    # masked_fill leaves zeros on the diagonal before its max/sum anyway.
    rows = lax.broadcasted_iota(jnp.int32, (tm, Bp), 0) + row0
    cols = lax.broadcasted_iota(jnp.int32, (tm, Bp), 1)
    invalid = (rows == cols) | (rows >= true_b) | (cols >= true_b)
    c2 = jnp.where(invalid, 0.0, c2)
    c1 = jnp.where(invalid, 0.0, c1)

    if max_violation:
        # cost_enc2.max(1): complete per row within this tile.
        rowred_ref[...] = jnp.max(c2, axis=1, keepdims=True).reshape(1, tm, 1)
        # cost_enc1.max(0): partial column-max over this tile's rows; the
        # wrapper max-reduces across tiles before summing.
        colmax_ref[...] = jnp.max(c1, axis=0, keepdims=True).reshape(1, 1, Bp)
    else:
        rowred_ref[...] = jnp.sum(c2 + c1, axis=1, keepdims=True).reshape(1, tm, 1)
        colmax_ref[...] = jnp.zeros_like(colmax_ref)


def _round_up(x, m):
    return ((x + m - 1) // m) * m


def _vmem_limit_bytes():
    # ~3/4 of physical VMEM per generation (v5e/v6e 128 MiB -> 96 MiB,
    # v7x 64 MiB -> 48 MiB); fall back to the compiler default if unavailable.
    try:
        return int(pltpu.get_tpu_info().vmem_capacity_bytes * 3 // 4)
    except Exception:
        return None


def max_margin(enc1, enc2, *, margin=0.2, max_violation=False):
    """JAX/Pallas equivalent of MaxMargin.forward. Returns {'loss': ...}."""
    assert margin > 0.0, "margin must be > 0."
    assert enc1.shape == enc2.shape, "shapes must match"
    B, D = enc1.shape

    if B == 1:
        # PyTorch returns torch.tensor([0.001]) for a single-element batch.
        return {"loss": jnp.array([0.001], dtype=jnp.float32)}

    # ---- hoisted prologue (O(B*D), fused by XLA) --------------------------
    e1 = enc1.astype(jnp.float32)
    e2 = enc2.astype(jnp.float32)
    # Row L2-normalization (== x / x.norm(p=2, dim=1).unsqueeze(1)).
    # NOTE: zero input rows -> NaN, matching the PyTorch divide-by-zero.
    e1n = e1 * lax.rsqrt(jnp.sum(e1 * e1, axis=1, keepdims=True))
    e2n = e2 * lax.rsqrt(jnp.sum(e2 * e2, axis=1, keepdims=True))
    # Full scores diagonal in f32: diag[i] = <e1n[i], e2n[i]>.  Feeding it to
    # the kernel removes the need for a second (transposed) matmul and for
    # enc1 to be fully VMEM-resident.
    diag = jnp.sum(e1n * e2n, axis=1)

    # ---- padding: feats -> multiple of 128 lanes, batch -> multiple of tm --
    tm = 128 if B >= 128 else _round_up(B, 8)
    Bp = _round_up(B, tm)
    Dp = max(128, _round_up(D, 128))
    e1n = jnp.pad(e1n, ((0, Bp - B), (0, Dp - D)))
    e2n = jnp.pad(e2n, ((0, Bp - B), (0, Dp - D)))
    diag = jnp.pad(diag, ((0, Bp - B),))
    # bf16 operands for full-rate MXU; accumulation stays f32 in the kernel.
    e1n_b = e1n.astype(jnp.bfloat16)
    e2n_b = e2n.astype(jnp.bfloat16)
    diag_row = diag.reshape(Bp, 1)
    diag_col = diag.reshape(1, Bp)

    nt = Bp // tm
    kernel = functools.partial(
        _max_margin_kernel, margin=float(margin),
        max_violation=bool(max_violation), true_b=B, tm=tm)

    cost = pl.CostEstimate(
        flops=2 * Bp * Bp * Dp,                      # single NT matmul
        transcendentals=0,                           # normalization hoisted
        bytes_accessed=(2 * Bp * Dp * 2              # bf16 operand reads
                        + 2 * Bp * 4                 # diagonal reads
                        + (nt * tm + nt * Bp) * 4),  # partial-output writes
    )

    rowred, colmax = pl.pallas_call(
        kernel,
        out_shape=(jax.ShapeDtypeStruct((nt, tm, 1), jnp.float32),
                   jax.ShapeDtypeStruct((nt, 1, Bp), jnp.float32)),
        grid=(nt,),
        in_specs=[
            pl.BlockSpec((tm, Dp), lambda t: (t, 0)),   # enc1 rows: streamed
            pl.BlockSpec((tm, 1), lambda t: (t, 0)),    # diag for those rows
            pl.BlockSpec((Bp, Dp), lambda t: (0, 0)),   # enc2: resident
            pl.BlockSpec((1, Bp), lambda t: (0, 0)),    # full diag (columns)
        ],
        out_specs=(
            pl.BlockSpec((1, tm, 1), lambda t: (t, 0, 0)),
            pl.BlockSpec((1, 1, Bp), lambda t: (t, 0, 0)),
        ),
        compiler_params=pltpu.CompilerParams(
            # No carried state / init step -> truly parallel row-tile axis
            # (uses both TensorCores on v7x; neutral on v5e/v6e).
            dimension_semantics=("parallel",),
            vmem_limit_bytes=_vmem_limit_bytes(),
        ),
        cost_estimate=cost,
    )(e1n_b, diag_row, e2n_b, diag_col)

    denom = float(B * B - B)
    if max_violation:
        loss = (jnp.sum(rowred) + jnp.sum(jnp.max(colmax, axis=0))) / denom
    else:
        loss = jnp.sum(rowred) / denom
    return {"loss": loss}


def _reference(enc1, enc2, margin, max_violation):
    """Pure-JAX reference mirroring the PyTorch module (for sanity check)."""
    e1 = enc1 / jnp.linalg.norm(enc1, axis=1, keepdims=True)
    e2 = enc2 / jnp.linalg.norm(enc2, axis=1, keepdims=True)
    scores = e1 @ e2.T
    diag = jnp.diag(scores).reshape(-1, 1)
    d1 = diag                      # broadcasts over columns
    d2 = diag.T                    # broadcasts over rows
    c1 = jnp.maximum(margin + scores - d2, 0.0)
    c2 = jnp.maximum(margin + scores - d1, 0.0)
    eye = jnp.eye(scores.shape[0], dtype=bool)
    c1 = jnp.where(eye, 0.0, c1)
    c2 = jnp.where(eye, 0.0, c2)
    B = scores.shape[0]
    denom = B * B - B
    if max_violation:
        return (jnp.max(c2, axis=1) + jnp.max(c1, axis=0)).sum() / denom
    return (c2 + c1).sum() / denom


if __name__ == "__main__":
    key = jax.random.PRNGKey(0)
    k1, k2 = jax.random.split(key)
    B, D = 8, 32
    enc1 = jax.random.normal(k1, (B, D), dtype=jnp.float32)
    enc2 = jax.random.normal(k2, (B, D), dtype=jnp.float32)

    margin = 0.2

    # bf16 MXU operands -> loosened tolerances vs the f32 reference.
    for max_violation in (False, True):
        out = max_margin(enc1, enc2, margin=margin, max_violation=max_violation)
        loss = jax.block_until_ready(out["loss"])
        ref = _reference(enc1, enc2, margin, max_violation)
        assert jnp.allclose(loss, ref, rtol=3e-2, atol=3e-3), \
            (max_violation, float(loss), float(ref))

    # Ragged batch (exercises batch padding + masking), both modes.
    enc1r, enc2r = enc1[:6], enc2[:6]
    enc1r = jnp.concatenate([enc1r, enc1[:4] + 0.5], axis=0)   # B = 10
    enc2r = jnp.concatenate([enc2r, enc2[:4] - 0.5], axis=0)
    for max_violation in (False, True):
        out = max_margin(enc1r, enc2r, margin=margin, max_violation=max_violation)
        loss = jax.block_until_ready(out["loss"])
        ref = _reference(enc1r, enc2r, margin, max_violation)
        assert jnp.allclose(loss, ref, rtol=3e-2, atol=3e-3), \
            (max_violation, float(loss), float(ref))

    # B == 1 edge case (matches torch.tensor([0.001])).
    out1 = max_margin(enc1[:1], enc2[:1], margin=margin)
    jax.block_until_ready(out1["loss"])

    print("KERNEL_OK")
</pallas_src>

<mosaic_0001>
module attributes {stable_mosaic.version = 11 : i64} {
  func.func @_max_margin_kernel(%arg0: i32, %arg1: memref<8x128xbf16, #tpu.memory_space<vmem>>, %arg2: memref<8x1xf32, #tpu.memory_space<vmem>>, %arg3: memref<8x128xbf16, #tpu.memory_space<vmem>>, %arg4: memref<1x8xf32, #tpu.memory_space<vmem>>, %arg5: memref<1x8x1xf32, #tpu.memory_space<vmem>>, %arg6: memref<1x1x8xf32, #tpu.memory_space<vmem>>) attributes {dimension_semantics = [#tpu.dimension_semantics<parallel>], iteration_bounds = array<i64: 1>, scalar_prefetch = 0 : i64, scratch_operands = 0 : i64, tpu.core_type = #tpu.core_type<tc>, window_params = [{transform_indices = @transform_0, window_bounds = array<i64: 8, 128>}, {transform_indices = @transform_1, window_bounds = array<i64: 8, 1>}, {pipeline_mode = #tpu.pipeline_mode<synchronous>, transform_indices = @transform_2, window_bounds = array<i64: 8, 128>}, {pipeline_mode = #tpu.pipeline_mode<synchronous>, transform_indices = @transform_3, window_bounds = array<i64: 1, 8>}, {transform_indices = @transform_4, window_bounds = array<i64: 1, 8, 1>}, {transform_indices = @transform_5, window_bounds = array<i64: 1, 1, 8>}]} {
    %c8_i32 = arith.constant 8 : i32
    %0 = arith.muli %arg0, %c8_i32 : i32
    %c0 = arith.constant 0 : index
    %c0_0 = arith.constant 0 : index
    %1 = vector.load %arg1[%c0, %c0_0] : memref<8x128xbf16, #tpu.memory_space<vmem>>, vector<8x128xbf16>
    %c0_1 = arith.constant 0 : index
    %c0_2 = arith.constant 0 : index
    %2 = vector.load %arg3[%c0_1, %c0_2] : memref<8x128xbf16, #tpu.memory_space<vmem>>, vector<8x128xbf16>
    %c0_3 = arith.constant 0 : index
    %c0_4 = arith.constant 0 : index
    %3 = vector.load %arg2[%c0_3, %c0_4] : memref<8x1xf32, #tpu.memory_space<vmem>>, vector<8x1xf32>
    %c0_5 = arith.constant 0 : index
    %c0_6 = arith.constant 0 : index
    %4 = vector.load %arg4[%c0_5, %c0_6] : memref<1x8xf32, #tpu.memory_space<vmem>>, vector<1x8xf32>
    %cst = arith.constant dense<0.000000e+00> : vector<8x8xf32>
    %5 = tpu.matmul %1, %2, %cst {dimension_numbers = #tpu.dot_dimension_numbers<[1], [1], [0], [0], [0, 0, 1, 0], [], []>} : vector<8x128xbf16>, vector<8x128xbf16>, vector<8x8xf32> -> vector<8x8xf32>
    %cst_7 = arith.constant 2.000000e-01 : f32
    %6 = vector.broadcast %cst_7 : f32 to vector<8x8xf32>
    %7 = arith.addf %6, %5 : vector<8x8xf32>
    %8 = vector.broadcast %3 : vector<8x1xf32> to vector<8x8xf32>
    %9 = arith.subf %7, %8 : vector<8x8xf32>
    %cst_8 = arith.constant 0.000000e+00 : f32
    %10 = vector.broadcast %cst_8 : f32 to vector<8x8xf32>
    %11 = arith.maximumf %9, %10 : vector<8x8xf32>
    %cst_9 = arith.constant 2.000000e-01 : f32
    %12 = vector.broadcast %cst_9 : f32 to vector<8x8xf32>
    %13 = arith.addf %12, %5 : vector<8x8xf32>
    %14 = vector.broadcast %4 : vector<1x8xf32> to vector<8x8xf32>
    %15 = arith.subf %13, %14 : vector<8x8xf32>
    %cst_10 = arith.constant 0.000000e+00 : f32
    %16 = vector.broadcast %cst_10 : f32 to vector<8x8xf32>
    %17 = arith.maximumf %15, %16 : vector<8x8xf32>
    %18 = tpu.iota {dimensions = array<i32: 0>} : vector<8x8xi32>
    %19 = vector.broadcast %0 : i32 to vector<8x8xi32>
    %20 = arith.addi %18, %19 : vector<8x8xi32>
    %21 = tpu.iota {dimensions = array<i32: 1>} : vector<8x8xi32>
    %22 = arith.cmpi eq, %20, %21 : vector<8x8xi32>
    %c8_i32_11 = arith.constant 8 : i32
    %23 = vector.broadcast %c8_i32_11 : i32 to vector<8x8xi32>
    %24 = arith.cmpi sge, %20, %23 : vector<8x8xi32>
    %25 = arith.ori %22, %24 : vector<8x8xi1>
    %c8_i32_12 = arith.constant 8 : i32
    %26 = vector.broadcast %c8_i32_12 : i32 to vector<8x8xi32>
    %27 = arith.cmpi sge, %21, %26 : vector<8x8xi32>
    %28 = arith.ori %25, %27 : vector<8x8xi1>
    %cst_13 = arith.constant 0.000000e+00 : f32
    %29 = vector.broadcast %cst_13 : f32 to vector<8x8xf32>
    %30 = arith.select %28, %29, %11 : vector<8x8xi1>, vector<8x8xf32>
    %cst_14 = arith.constant 0.000000e+00 : f32
    %31 = vector.broadcast %cst_14 : f32 to vector<8x8xf32>
    %32 = arith.select %28, %31, %17 : vector<8x8xi1>, vector<8x8xf32>
    %33 = arith.addf %30, %32 : vector<8x8xf32>
    %cst_15 = arith.constant dense<0.000000e+00> : vector<8xf32>
    %34 = vector.multi_reduction <add>, %33, %cst_15 [1] : vector<8x8xf32> to vector<8xf32>
    %35 = vector.shape_cast %34 : vector<8xf32> to vector<8x1xf32>
    %36 = vector.shape_cast %35 : vector<8x1xf32> to vector<1x8x1xf32>
    %c0_16 = arith.constant 0 : index
    %c0_17 = arith.constant 0 : index
    %c0_18 = arith.constant 0 : index
    %37 = vector.load %arg5[%c0_16, %c0_17, %c0_18] : memref<1x8x1xf32, #tpu.memory_space<vmem>>, vector<1x8x1xf32>
    tpu.vector_store %arg5[%c0_16, %c0_17, %c0_18], %36 {strides = array<i32>} : memref<1x8x1xf32, #tpu.memory_space<vmem>>, vector<1x8x1xf32>,
    %cst_19 = arith.constant 0.000000e+00 : f32
    %38 = vector.broadcast %cst_19 : f32 to vector<1x1x8xf32>
    %c0_20 = arith.constant 0 : index
    %c0_21 = arith.constant 0 : index
    %c0_22 = arith.constant 0 : index
    %39 = vector.load %arg6[%c0_20, %c0_21, %c0_22] : memref<1x1x8xf32, #tpu.memory_space<vmem>>, vector<1x1x8xf32>
    tpu.vector_store %arg6[%c0_20, %c0_21, %c0_22], %38 {strides = array<i32>} : memref<1x1x8xf32, #tpu.memory_space<vmem>>, vector<1x1x8xf32>,
    return
  }
  func.func @transform_0(%arg0: i32) -> (i32, i32) {
    %c0_i32 = arith.constant 0 : i32
    %c0_i32_0 = arith.constant 0 : i32
    return %arg0, %c0_i32 : i32, i32
  }
  func.func @transform_1(%arg0: i32) -> (i32, i32) {
    %c0_i32 = arith.constant 0 : i32
    %c0_i32_0 = arith.constant 0 : i32
    return %arg0, %c0_i32 : i32, i32
  }
  func.func @transform_2(%arg0: i32) -> (i32, i32) {
    %c0_i32 = arith.constant 0 : i32
    %c0_i32_0 = arith.constant 0 : i32
    %c0_i32_1 = arith.constant 0 : i32
    return %c0_i32, %c0_i32_0 : i32, i32
  }
  func.func @transform_3(%arg0: i32) -> (i32, i32) {
    %c0_i32 = arith.constant 0 : i32
    %c0_i32_0 = arith.constant 0 : i32
    %c0_i32_1 = arith.constant 0 : i32
    return %c0_i32, %c0_i32_0 : i32, i32
  }
  func.func @transform_4(%arg0: i32) -> (i32, i32, i32) {
    %c0_i32 = arith.constant 0 : i32
    %c0_i32_0 = arith.constant 0 : i32
    %c0_i32_1 = arith.constant 0 : i32
    return %arg0, %c0_i32, %c0_i32_0 : i32, i32, i32
  }
  func.func @transform_5(%arg0: i32) -> (i32, i32, i32) {
    %c0_i32 = arith.constant 0 : i32
    %c0_i32_0 = arith.constant 0 : i32
    %c0_i32_1 = arith.constant 0 : i32
    return %arg0, %c0_i32, %c0_i32_0 : i32, i32, i32
  }
}

</mosaic_0001>

<bundles_post_ra>
// kernel: tpu_custom_call.1
= control target key start
LH: loop header
LB: loop body
LE: loop exit
PB: predicated region body
PF: predicated region fallthrough
CT: control target
= control target key end

     0   :  { %v159_v1 = vmov 0.0   ;;  %vm160_vm0 = vmmov 0   ;;  %s220_s0 = inlined_call_operand.vmem [shape: bf16[8,128], index: 0, kind: input, shape index: {}]   ;;  %s221_s1 = inlined_call_operand.vmem [shape: f32[8,1], index: 1, kind: input, shape index: {}]   ;;  %s222_s2 = inlined_call_operand.vmem [shape: bf16[8,128], index: 2, kind: input, shape index: {}]   ;;  %s223_s3 = inlined_call_operand.vmem [shape: f32[1,8], index: 3, kind: input, shape index: {}]   ;;  %s224_s4 = inlined_call_operand.vmem [shape: f32[1,8,1], index: 4, kind: output, shape index: {0}]   ;;  %s225_s5 = inlined_call_operand.hbm [shape: f32[1,1,8], index: 5, kind: output, shape index: {1}]  }
   0x1   :  { %v23_v0 = vld [vmem:[%s222_s2] sm:$0xf]  ;;  %124 = vmatprep.subr.bf16.mxu0 %v159_v1  ;;  %126 = vmatprep.mubr.msk.bf16.mxu0 %vm160_vm0, %v159_v1 }
   0x2   :  { %v24_v2 = vld [vmem:[%s221_s1] sm:$0xff] }
   0x3   :  { %11 = vsyncpa [#allocation3], 0  ;;  %125 = vmatpush3.bf16.xpose.msra.mxu0 %v23_v0  ;;  %v161_v3 = vmov 0   ;;  %v22_v4 = vld [vmem:[%s220_s0] sm:$0xf]  ;;  %v81_v5 = vlaneseq  ;;  %vm95_vm4 = vcmask 64512  }
   0x4   :  { %134 = vset.pattern.permute.xlu0 %v161_v3  ;;  %v121_v8 = vld [vmem:[%s223_s3] ss:$0 sm:$0xff]  ;;  %vm101_vm5 = vcmask 57344   ;;  %s162_s0 = smov [#allocation2]  }
   0x5   :  { %68 = vperm.xlu0 %134, %v24_v2   ;;  %v82_v6 = vshrl.u32 %v81_v5, 7  ;;  %v86_v7 = vand.u32 127, %v81_v5  ;;  %s111_s1 = sshll.u32 %s162_s0, 4  ;;  %102 = vst.msk [vmem:[#allocation2] sm:$0x1] %vm101_vm5, %v159_v1  ;;  %s112_s1 = int_to_ptr.vmem [resolvable:$true] %s111_s1 }
   0x6   :  { %s135_s3 = scalar_lea.vmem %s112_s1, 16  ;;  %s139_s25 = scalar_lea.vmem %s112_s1, 32 }
   0x7   :  { %vm87_vm1 = vcmp.eq.s32.totalorder %v82_v6, %v86_v7  ;;  %vm90_vm2 = vcmp.ge.s32.totalorder %v86_v7, 8  ;;  %p136_p0 = scmp.ne.s32.totalorder %s112_s1, %s135_s3  ;;  %p140_p1 = scmp.lt.s32.totalorder %s112_s1, %s112_s1 }
   0x8   :  { %vm91_vm3 = vmor %vm87_vm1, %vm90_vm2  ;;  %p141_p2 = scmp.lt.s32.totalorder %s139_s25, %s135_s3 }
   0xa   :  { %127 = vmatmul.mubr.bf16.vlgmr.msra.gmra.mrb[0].mxu0 %v22_v4  ;;  %p142_p3 = por %p141_p2, %p140_p1 }
   0xc   :  { %p143_p4 = pnand %p142_p3, %p136_p0 }
  0x84   :  { %v69_v10 = vpop.permute.xlu0 %68 }
  0xdd   :  { %v60_v9 = vpop.f32.mrb[0].mxu0 }
  0xde   :  { %v61_v11 = vadd.f32 0.2, %v60_v9  ;;  %v128_v12 = vpop.f32.mrb[1].mxu0 }
  0xdf   :  { %v63_v13 = vpop.f32.mrb[2].mxu0 }
  0xe0   :  { %v79_v14 = vsub.f32 %v61_v11, %v121_v8  ;;  %v71_v15 = vsub.f32 %v61_v11, %v69_v10  ;;  %v129_v16 = vpop.f32.mrb[3].mxu0 }
  0xe2   :  { %v80_v17 = vmax.f32 %v79_v14, 0.0  ;;  %v72_v18 = vmax.f32 %v71_v15, 0.0 }
  0xe4   :  { %v92_v19 = vsel %vm91_vm3, 0.0, %v72_v18  ;;  %v93_v20 = vsel %vm91_vm3, 0.0, %v80_v17 }
  0xe5   :  { %v94_v21 = vadd.f32 %v93_v20, %v92_v19 }
  0xe7   :  { %v96_v22 = vsel %vm95_vm4, %v94_v21, 0.0 }
  0xe8   :  { %97 = vadd.xlane.f32.xlu0 %v96_v22 }
  0xe9   :  { %146 = shalt.err (!%p143_p4)
}
  0xea   :  { %s147_s28 = scalar_lea.hbm %s225_s5, 16 }
  0xeb   :  { %p148_p5 = scmp.ne.s32.totalorder %s225_s5, %s147_s28  ;;  %p151_p6 = scmp.lt.u32.totalorder %s147_s28, %s225_s5 }
  0xed   :  { %p153_p7 = pnand %p151_p6, %p148_p5 }
  0xef   :  { %156 = shalt.err (!%p153_p7)
}
  0xf0   :  { %114 = dma.vmem_to_hbm [thread:$0]  %s112_s1, 16, %s225_s5, [#allocation3]   ;;  %vm99_vm6 = vcmask 7168  }
 0x175   :  { %v98_v23 = vpop.xlane.xlu0 %97 }
 0x176   :  { %100 = vst.msk [vmem:[%s224_s4] sm:$0xff] %vm99_vm6, %v98_v23 }
 0x177   :  { %157 = dma.done.wait [#allocation3], 16  }
 0x178   :  { %158 = vsyncadd [#allocation3], 4294967280 }
 0x179   :  { %120 = vsyncpa [#allocation3], 1 }

</bundles_post_ra>
